<compile_context>
chip_gen: v7x
topology: tpu7x:2x2x1
jax: 0.10.0
libtpu: 0.0.40
codegen_flags: <defaults>
</compile_context>

<pallas_src>
import jax
import jax.numpy as jnp
from jax.experimental import pallas as pl
from jax.experimental.pallas import tpu as pltpu

LN_EPS = 1e-5  # PyTorch nn.LayerNorm default eps


def _layernorm(x, gamma, beta):
    # Single-pass statistics: E[x^2] - E[x]^2 (both cross-lane reductions are
    # independent; avoids the dependent second pass of the two-pass form).
    mu = jnp.mean(x, axis=-1, keepdims=True)
    ms = jnp.mean(x * x, axis=-1, keepdims=True)
    var = jnp.maximum(ms - mu * mu, 0.0)
    return (x - mu) * jax.lax.rsqrt(var + LN_EPS) * gamma + beta


def _leaky_relu(x, slope=0.2):
    return jnp.where(x >= 0, x, slope * x)


def audstyle_enc_kernel(
    aud_ref, noise_ref,            # (tb, aud_size), (tb, dim_noise)  f32
    w1a_ref, w1n_ref, b1_ref,      # (aud_size,64) (dim_noise,64) bf16, (1,64) f32
    g1_ref, be1_ref,               # LayerNorm(64) gamma/beta, (1, 64) f32
    w2_ref, b2_ref,                # (64, 128) bf16, (1, 128) f32
    g2_ref, be2_ref,               # LayerNorm(128) gamma/beta, (1, 128) f32
    wh_ref, bh_ref,                # fused heads (128, 2*dim_z) bf16, (1, 2*dim_z) f32
    out_ref,                       # (tb, 2*dim_z) f32  -> [mean | std]
):
    mdt = w1a_ref.dtype            # matmul-operand dtype (bf16); accum stays f32
    aud = aud_ref[...].astype(mdt)
    noi = noise_ref[...].astype(mdt)

    # ---- enc layer 1: (split) Linear -> LayerNorm -> LeakyReLU(0.2) ----
    # concat([aud, noise]) @ W1  ==  aud @ W1[:aud_size] + noise @ W1[aud_size:]
    h = (jnp.dot(aud, w1a_ref[...], preferred_element_type=jnp.float32)
         + jnp.dot(noi, w1n_ref[...], preferred_element_type=jnp.float32)
         + b1_ref[...])
    h = _leaky_relu(_layernorm(h, g1_ref[...], be1_ref[...]))

    # ---- enc layer 2: Linear -> LayerNorm -> LeakyReLU(0.2) ----
    h = jnp.dot(h.astype(mdt), w2_ref[...],
                preferred_element_type=jnp.float32) + b2_ref[...]
    h = _leaky_relu(_layernorm(h, g2_ref[...], be2_ref[...]))

    # ---- fused heads: [mean | std] in one matmul / one lane-dense store ----
    out_ref[...] = (jnp.dot(h.astype(mdt), wh_ref[...],
                            preferred_element_type=jnp.float32)
                    + bh_ref[...]).astype(out_ref.dtype)


def init_params(key, aud_size, dim_z, dim_noise=30, nf=64):
    """Deterministic synthetic parameters (shapes match the PyTorch module)."""
    din = aud_size + dim_noise
    ks = jax.random.split(key, 4)

    def lin(k, fan_in, fan_out):
        bound = 1.0 / jnp.sqrt(fan_in)
        kw, kb = jax.random.split(k)
        w = jax.random.uniform(kw, (fan_in, fan_out), jnp.float32, -bound, bound)
        b = jax.random.uniform(kb, (1, fan_out), jnp.float32, -bound, bound)
        return w, b

    w1, b1 = lin(ks[0], din, nf)
    w2, b2 = lin(ks[1], nf, nf * 2)
    wm, bm = lin(ks[2], nf * 2, dim_z)
    ws, bs = lin(ks[3], nf * 2, dim_z)
    g1 = jnp.ones((1, nf), jnp.float32)
    be1 = jnp.zeros((1, nf), jnp.float32)
    g2 = jnp.ones((1, nf * 2), jnp.float32)
    be2 = jnp.zeros((1, nf * 2), jnp.float32)
    return dict(w1=w1, b1=b1, g1=g1, be1=be1,
                w2=w2, b2=b2, g2=g2, be2=be2,
                wm=wm, bm=bm, ws=ws, bs=bs)


def audstyle_enc_forward(aud, params, noise_key=None, noise=None, dim_noise=30,
                         matmul_dtype=jnp.bfloat16, tile_b=512):
    """JAX glue: noise + tiny weight plumbing, then one batch-tiled Pallas call."""
    B, aud_size = aud.shape
    dim_z = params["wm"].shape[1]

    if noise is None:
        # TODO(synk): torch.randn RNG cannot be reproduced bit-for-bit in JAX;
        # noise matches only distributionally.
        noise = jax.random.normal(noise_key, (B, dim_noise), dtype=jnp.float32)

    # One-time, tiny parameter plumbing (split W1, fuse heads, bf16 operands).
    w1a = params["w1"][:aud_size].astype(matmul_dtype)
    w1n = params["w1"][aud_size:].astype(matmul_dtype)
    w2 = params["w2"].astype(matmul_dtype)
    wh = jnp.concatenate([params["wm"], params["ws"]], axis=1).astype(matmul_dtype)
    bh = jnp.concatenate([params["bm"], params["bs"]], axis=1)

    weights = (w1a, w1n, params["b1"], params["g1"], params["be1"],
               w2, params["b2"], params["g2"], params["be2"],
               wh, bh)

    # Batch tiling: one full-extent block if B is small, else TILE_B rows/step.
    tile_b = max(8, (tile_b // 8) * 8)
    tb = B if B <= tile_b else tile_b
    grid = (pl.cdiv(B, tb),)

    row_map = lambda i: (i, 0)   # activations / output march over batch
    rep_map = lambda i: (0, 0)   # weights stay resident across grid steps

    in_specs = ([pl.BlockSpec((tb, aud.shape[1]), row_map),
                 pl.BlockSpec((tb, noise.shape[1]), row_map)]
                + [pl.BlockSpec(w.shape, rep_map) for w in weights])

    out = pl.pallas_call(
        audstyle_enc_kernel,
        out_shape=jax.ShapeDtypeStruct((B, 2 * dim_z), jnp.float32),
        grid=grid,
        in_specs=in_specs,
        out_specs=pl.BlockSpec((tb, 2 * dim_z), row_map),
        compiler_params=pltpu.CompilerParams(
            dimension_semantics=("parallel",),
            vmem_limit_bytes=32 * 1024 * 1024),
    )(aud, noise, *weights)

    return out[:, :dim_z], out[:, dim_z:]


# ---------------- references for the self-test ----------------

def reference_mimic(aud, noise, params, matmul_dtype=jnp.bfloat16):
    """Pure-JAX replica of the exact kernel math (bf16 dots, f32 accum)."""
    aud_size = aud.shape[1]
    dim_z = params["wm"].shape[1]
    mdt = matmul_dtype
    h = (jnp.dot(aud.astype(mdt), params["w1"][:aud_size].astype(mdt),
                 preferred_element_type=jnp.float32)
         + jnp.dot(noise.astype(mdt), params["w1"][aud_size:].astype(mdt),
                   preferred_element_type=jnp.float32)
         + params["b1"])
    h = _leaky_relu(_layernorm(h, params["g1"], params["be1"]))
    h = jnp.dot(h.astype(mdt), params["w2"].astype(mdt),
                preferred_element_type=jnp.float32) + params["b2"]
    h = _leaky_relu(_layernorm(h, params["g2"], params["be2"]))
    wh = jnp.concatenate([params["wm"], params["ws"]], 1).astype(mdt)
    bh = jnp.concatenate([params["bm"], params["bs"]], 1)
    out = jnp.dot(h.astype(mdt), wh, preferred_element_type=jnp.float32) + bh
    return out[:, :dim_z], out[:, dim_z:]


def reference_f32(aud, noise, params):
    """PyTorch-module-style reference in full f32 (two-pass LN variance)."""
    y = jnp.concatenate([aud, noise], axis=1)
    h = y @ params["w1"] + params["b1"]
    mu = h.mean(-1, keepdims=True); var = ((h - mu) ** 2).mean(-1, keepdims=True)
    h = (h - mu) / jnp.sqrt(var + LN_EPS) * params["g1"] + params["be1"]
    h = jnp.where(h >= 0, h, 0.2 * h)
    h = h @ params["w2"] + params["b2"]
    mu = h.mean(-1, keepdims=True); var = ((h - mu) ** 2).mean(-1, keepdims=True)
    h = (h - mu) / jnp.sqrt(var + LN_EPS) * params["g2"] + params["be2"]
    h = jnp.where(h >= 0, h, 0.2 * h)
    return h @ params["wm"] + params["bm"], h @ params["ws"] + params["bs"]


if __name__ == "__main__":
    aud_size, dim_z, dim_noise = 16, 8, 30

    key = jax.random.PRNGKey(0)
    k_param, k_data = jax.random.split(key)
    params = init_params(k_param, aud_size, dim_z, dim_noise)

    def run_check(B, tile_b):
        ka, kn = jax.random.split(jax.random.fold_in(k_data, B))
        aud = jax.random.normal(ka, (B, aud_size), dtype=jnp.float32)
        noise = jax.random.normal(kn, (B, dim_noise), dtype=jnp.float32)

        mean, std = audstyle_enc_forward(aud, params, noise=noise,
                                         dim_noise=dim_noise, tile_b=tile_b)
        jax.block_until_ready((mean, std))
        assert mean.shape == (B, dim_z) and std.shape == (B, dim_z)

        # Tight check against the kernel-equivalent math.
        m_ref, s_ref = reference_mimic(aud, noise, params)
        assert jnp.allclose(mean, m_ref, atol=2e-3, rtol=2e-3)
        assert jnp.allclose(std, s_ref, atol=2e-3, rtol=2e-3)

        # Loose check against the full-f32 PyTorch-style module math
        # (slack covers the bf16 matmul operands).
        m32, s32 = reference_f32(aud, noise, params)
        assert jnp.allclose(mean, m32, atol=5e-2, rtol=5e-2)
        assert jnp.allclose(std, s32, atol=5e-2, rtol=5e-2)

    # Small shape (single full-extent block) ...
    run_check(B=4, tile_b=512)
    # ... and a larger batch that exercises the pipelined grid (2 steps).
    run_check(B=1024, tile_b=512)

    print("KERNEL_OK")
</pallas_src>

<mosaic_0001>
module attributes {stable_mosaic.version = 11 : i64} {
  func.func @audstyle_enc_kernel(%arg0: i32, %arg1: memref<4x16xf32, #tpu.memory_space<vmem>>, %arg2: memref<4x30xf32, #tpu.memory_space<vmem>>, %arg3: memref<16x64xbf16, #tpu.memory_space<vmem>>, %arg4: memref<30x64xbf16, #tpu.memory_space<vmem>>, %arg5: memref<1x64xf32, #tpu.memory_space<vmem>>, %arg6: memref<1x64xf32, #tpu.memory_space<vmem>>, %arg7: memref<1x64xf32, #tpu.memory_space<vmem>>, %arg8: memref<64x128xbf16, #tpu.memory_space<vmem>>, %arg9: memref<1x128xf32, #tpu.memory_space<vmem>>, %arg10: memref<1x128xf32, #tpu.memory_space<vmem>>, %arg11: memref<1x128xf32, #tpu.memory_space<vmem>>, %arg12: memref<128x16xbf16, #tpu.memory_space<vmem>>, %arg13: memref<1x16xf32, #tpu.memory_space<vmem>>, %arg14: memref<4x16xf32, #tpu.memory_space<vmem>>) attributes {dimension_semantics = [#tpu.dimension_semantics<parallel>], iteration_bounds = array<i64: 1>, scalar_prefetch = 0 : i64, scratch_operands = 0 : i64, tpu.core_type = #tpu.core_type<tc>, window_params = [{transform_indices = @transform_0, window_bounds = array<i64: 4, 16>}, {transform_indices = @transform_1, window_bounds = array<i64: 4, 30>}, {pipeline_mode = #tpu.pipeline_mode<synchronous>, transform_indices = @transform_2, window_bounds = array<i64: 16, 64>}, {pipeline_mode = #tpu.pipeline_mode<synchronous>, transform_indices = @transform_3, window_bounds = array<i64: 30, 64>}, {pipeline_mode = #tpu.pipeline_mode<synchronous>, transform_indices = @transform_4, window_bounds = array<i64: 1, 64>}, {pipeline_mode = #tpu.pipeline_mode<synchronous>, transform_indices = @transform_5, window_bounds = array<i64: 1, 64>}, {pipeline_mode = #tpu.pipeline_mode<synchronous>, transform_indices = @transform_6, window_bounds = array<i64: 1, 64>}, {pipeline_mode = #tpu.pipeline_mode<synchronous>, transform_indices = @transform_7, window_bounds = array<i64: 64, 128>}, {pipeline_mode = #tpu.pipeline_mode<synchronous>, transform_indices = @transform_8, window_bounds = array<i64: 1, 128>}, {pipeline_mode = #tpu.pipeline_mode<synchronous>, transform_indices = @transform_9, window_bounds = array<i64: 1, 128>}, {pipeline_mode = #tpu.pipeline_mode<synchronous>, transform_indices = @transform_10, window_bounds = array<i64: 1, 128>}, {pipeline_mode = #tpu.pipeline_mode<synchronous>, transform_indices = @transform_11, window_bounds = array<i64: 128, 16>}, {pipeline_mode = #tpu.pipeline_mode<synchronous>, transform_indices = @transform_12, window_bounds = array<i64: 1, 16>}, {transform_indices = @transform_13, window_bounds = array<i64: 4, 16>}]} {
    %c0 = arith.constant 0 : index
    %c0_0 = arith.constant 0 : index
    %0 = vector.load %arg1[%c0, %c0_0] : memref<4x16xf32, #tpu.memory_space<vmem>>, vector<4x16xf32>
    %1 = arith.truncf %0 : vector<4x16xf32> to vector<4x16xbf16>
    %c0_1 = arith.constant 0 : index
    %c0_2 = arith.constant 0 : index
    %2 = vector.load %arg2[%c0_1, %c0_2] : memref<4x30xf32, #tpu.memory_space<vmem>>, vector<4x30xf32>
    %3 = arith.truncf %2 : vector<4x30xf32> to vector<4x30xbf16>
    %c0_3 = arith.constant 0 : index
    %c0_4 = arith.constant 0 : index
    %4 = vector.load %arg3[%c0_3, %c0_4] : memref<16x64xbf16, #tpu.memory_space<vmem>>, vector<16x64xbf16>
    %cst = arith.constant dense<0.000000e+00> : vector<4x64xf32>
    %5 = tpu.matmul %1, %4, %cst {dimension_numbers = #tpu.dot_dimension_numbers<[1], [0], [0], [1], [0, 0, 1, 1], [], []>} : vector<4x16xbf16>, vector<16x64xbf16>, vector<4x64xf32> -> vector<4x64xf32>
    %c0_5 = arith.constant 0 : index
    %c0_6 = arith.constant 0 : index
    %6 = vector.load %arg4[%c0_5, %c0_6] : memref<30x64xbf16, #tpu.memory_space<vmem>>, vector<30x64xbf16>
    %cst_7 = arith.constant dense<0.000000e+00> : vector<4x64xf32>
    %7 = tpu.matmul %3, %6, %cst_7 {dimension_numbers = #tpu.dot_dimension_numbers<[1], [0], [0], [1], [0, 0, 1, 1], [], []>} : vector<4x30xbf16>, vector<30x64xbf16>, vector<4x64xf32> -> vector<4x64xf32>
    %8 = arith.addf %5, %7 : vector<4x64xf32>
    %c0_8 = arith.constant 0 : index
    %c0_9 = arith.constant 0 : index
    %9 = vector.load %arg5[%c0_8, %c0_9] : memref<1x64xf32, #tpu.memory_space<vmem>>, vector<1x64xf32>
    %10 = vector.broadcast %9 : vector<1x64xf32> to vector<4x64xf32>
    %11 = arith.addf %8, %10 : vector<4x64xf32>
    %c0_10 = arith.constant 0 : index
    %c0_11 = arith.constant 0 : index
    %12 = vector.load %arg6[%c0_10, %c0_11] : memref<1x64xf32, #tpu.memory_space<vmem>>, vector<1x64xf32>
    %c0_12 = arith.constant 0 : index
    %c0_13 = arith.constant 0 : index
    %13 = vector.load %arg7[%c0_12, %c0_13] : memref<1x64xf32, #tpu.memory_space<vmem>>, vector<1x64xf32>
    %cst_14 = arith.constant dense<0.000000e+00> : vector<4xf32>
    %14 = vector.multi_reduction <add>, %11, %cst_14 [1] : vector<4x64xf32> to vector<4xf32>
    %15 = vector.shape_cast %14 : vector<4xf32> to vector<4x1xf32>
    %cst_15 = arith.constant 6.400000e+01 : f32
    %16 = vector.broadcast %cst_15 : f32 to vector<4x1xf32>
    %17 = arith.divf %15, %16 : vector<4x1xf32>
    %18 = arith.mulf %11, %11 : vector<4x64xf32>
    %cst_16 = arith.constant dense<0.000000e+00> : vector<4xf32>
    %19 = vector.multi_reduction <add>, %18, %cst_16 [1] : vector<4x64xf32> to vector<4xf32>
    %20 = vector.shape_cast %19 : vector<4xf32> to vector<4x1xf32>
    %cst_17 = arith.constant 6.400000e+01 : f32
    %21 = vector.broadcast %cst_17 : f32 to vector<4x1xf32>
    %22 = arith.divf %20, %21 : vector<4x1xf32>
    %23 = arith.mulf %17, %17 : vector<4x1xf32>
    %24 = arith.subf %22, %23 : vector<4x1xf32>
    %cst_18 = arith.constant 0.000000e+00 : f32
    %25 = vector.broadcast %cst_18 : f32 to vector<4x1xf32>
    %26 = arith.maximumf %24, %25 : vector<4x1xf32>
    %27 = vector.broadcast %17 : vector<4x1xf32> to vector<4x64xf32>
    %28 = arith.subf %11, %27 : vector<4x64xf32>
    %cst_19 = arith.constant 9.99999974E-6 : f32
    %29 = vector.broadcast %cst_19 : f32 to vector<4x1xf32>
    %30 = arith.addf %26, %29 : vector<4x1xf32>
    %31 = math.rsqrt %30 : vector<4x1xf32>
    %32 = vector.broadcast %31 : vector<4x1xf32> to vector<4x64xf32>
    %33 = arith.mulf %28, %32 : vector<4x64xf32>
    %34 = vector.broadcast %12 : vector<1x64xf32> to vector<4x64xf32>
    %35 = arith.mulf %33, %34 : vector<4x64xf32>
    %36 = vector.broadcast %13 : vector<1x64xf32> to vector<4x64xf32>
    %37 = arith.addf %35, %36 : vector<4x64xf32>
    %cst_20 = arith.constant 0.000000e+00 : f32
    %38 = vector.broadcast %cst_20 : f32 to vector<4x64xf32>
    %39 = arith.cmpf oge, %37, %38 : vector<4x64xf32>
    %cst_21 = arith.constant 2.000000e-01 : f32
    %40 = vector.broadcast %cst_21 : f32 to vector<4x64xf32>
    %41 = arith.mulf %40, %37 : vector<4x64xf32>
    %42 = arith.select %39, %37, %41 : vector<4x64xi1>, vector<4x64xf32>
    %43 = arith.truncf %42 : vector<4x64xf32> to vector<4x64xbf16>
    %c0_22 = arith.constant 0 : index
    %c0_23 = arith.constant 0 : index
    %44 = vector.load %arg8[%c0_22, %c0_23] : memref<64x128xbf16, #tpu.memory_space<vmem>>, vector<64x128xbf16>
    %cst_24 = arith.constant dense<0.000000e+00> : vector<4x128xf32>
    %45 = tpu.matmul %43, %44, %cst_24 {dimension_numbers = #tpu.dot_dimension_numbers<[1], [0], [0], [1], [0, 0, 1, 1], [], []>} : vector<4x64xbf16>, vector<64x128xbf16>, vector<4x128xf32> -> vector<4x128xf32>
    %c0_25 = arith.constant 0 : index
    %c0_26 = arith.constant 0 : index
    %46 = vector.load %arg9[%c0_25, %c0_26] : memref<1x128xf32, #tpu.memory_space<vmem>>, vector<1x128xf32>
    %47 = vector.broadcast %46 : vector<1x128xf32> to vector<4x128xf32>
    %48 = arith.addf %45, %47 : vector<4x128xf32>
    %c0_27 = arith.constant 0 : index
    %c0_28 = arith.constant 0 : index
    %49 = vector.load %arg10[%c0_27, %c0_28] : memref<1x128xf32, #tpu.memory_space<vmem>>, vector<1x128xf32>
    %c0_29 = arith.constant 0 : index
    %c0_30 = arith.constant 0 : index
    %50 = vector.load %arg11[%c0_29, %c0_30] : memref<1x128xf32, #tpu.memory_space<vmem>>, vector<1x128xf32>
    %cst_31 = arith.constant dense<0.000000e+00> : vector<4xf32>
    %51 = vector.multi_reduction <add>, %48, %cst_31 [1] : vector<4x128xf32> to vector<4xf32>
    %52 = vector.shape_cast %51 : vector<4xf32> to vector<4x1xf32>
    %cst_32 = arith.constant 1.280000e+02 : f32
    %53 = vector.broadcast %cst_32 : f32 to vector<4x1xf32>
    %54 = arith.divf %52, %53 : vector<4x1xf32>
    %55 = arith.mulf %48, %48 : vector<4x128xf32>
    %cst_33 = arith.constant dense<0.000000e+00> : vector<4xf32>
    %56 = vector.multi_reduction <add>, %55, %cst_33 [1] : vector<4x128xf32> to vector<4xf32>
    %57 = vector.shape_cast %56 : vector<4xf32> to vector<4x1xf32>
    %cst_34 = arith.constant 1.280000e+02 : f32
    %58 = vector.broadcast %cst_34 : f32 to vector<4x1xf32>
    %59 = arith.divf %57, %58 : vector<4x1xf32>
    %60 = arith.mulf %54, %54 : vector<4x1xf32>
    %61 = arith.subf %59, %60 : vector<4x1xf32>
    %cst_35 = arith.constant 0.000000e+00 : f32
    %62 = vector.broadcast %cst_35 : f32 to vector<4x1xf32>
    %63 = arith.maximumf %61, %62 : vector<4x1xf32>
    %64 = vector.broadcast %54 : vector<4x1xf32> to vector<4x128xf32>
    %65 = arith.subf %48, %64 : vector<4x128xf32>
    %cst_36 = arith.constant 9.99999974E-6 : f32
    %66 = vector.broadcast %cst_36 : f32 to vector<4x1xf32>
    %67 = arith.addf %63, %66 : vector<4x1xf32>
    %68 = math.rsqrt %67 : vector<4x1xf32>
    %69 = vector.broadcast %68 : vector<4x1xf32> to vector<4x128xf32>
    %70 = arith.mulf %65, %69 : vector<4x128xf32>
    %71 = vector.broadcast %49 : vector<1x128xf32> to vector<4x128xf32>
    %72 = arith.mulf %70, %71 : vector<4x128xf32>
    %73 = vector.broadcast %50 : vector<1x128xf32> to vector<4x128xf32>
    %74 = arith.addf %72, %73 : vector<4x128xf32>
    %cst_37 = arith.constant 0.000000e+00 : f32
    %75 = vector.broadcast %cst_37 : f32 to vector<4x128xf32>
    %76 = arith.cmpf oge, %74, %75 : vector<4x128xf32>
    %cst_38 = arith.constant 2.000000e-01 : f32
    %77 = vector.broadcast %cst_38 : f32 to vector<4x128xf32>
    %78 = arith.mulf %77, %74 : vector<4x128xf32>
    %79 = arith.select %76, %74, %78 : vector<4x128xi1>, vector<4x128xf32>
    %80 = arith.truncf %79 : vector<4x128xf32> to vector<4x128xbf16>
    %c0_39 = arith.constant 0 : index
    %c0_40 = arith.constant 0 : index
    %81 = vector.load %arg12[%c0_39, %c0_40] : memref<128x16xbf16, #tpu.memory_space<vmem>>, vector<128x16xbf16>
    %cst_41 = arith.constant dense<0.000000e+00> : vector<4x16xf32>
    %82 = tpu.matmul %80, %81, %cst_41 {dimension_numbers = #tpu.dot_dimension_numbers<[1], [0], [0], [1], [0, 0, 1, 1], [], []>} : vector<4x128xbf16>, vector<128x16xbf16>, vector<4x16xf32> -> vector<4x16xf32>
    %c0_42 = arith.constant 0 : index
    %c0_43 = arith.constant 0 : index
    %83 = vector.load %arg13[%c0_42, %c0_43] : memref<1x16xf32, #tpu.memory_space<vmem>>, vector<1x16xf32>
    %84 = vector.broadcast %83 : vector<1x16xf32> to vector<4x16xf32>
    %85 = arith.addf %82, %84 : vector<4x16xf32>
    %c0_44 = arith.constant 0 : index
    %c0_45 = arith.constant 0 : index
    %86 = vector.load %arg14[%c0_44, %c0_45] : memref<4x16xf32, #tpu.memory_space<vmem>>, vector<4x16xf32>
    tpu.vector_store %arg14[%c0_44, %c0_45], %85 {strides = array<i32>} : memref<4x16xf32, #tpu.memory_space<vmem>>, vector<4x16xf32>,
    return
  }
  func.func @transform_0(%arg0: i32) -> (i32, i32) {
    %c0_i32 = arith.constant 0 : i32
    %c0_i32_0 = arith.constant 0 : i32
    return %arg0, %c0_i32 : i32, i32
  }
  func.func @transform_1(%arg0: i32) -> (i32, i32) {
    %c0_i32 = arith.constant 0 : i32
    %c0_i32_0 = arith.constant 0 : i32
    return %arg0, %c0_i32 : i32, i32
  }
  func.func @transform_2(%arg0: i32) -> (i32, i32) {
    %c0_i32 = arith.constant 0 : i32
    %c0_i32_0 = arith.constant 0 : i32
    %c0_i32_1 = arith.constant 0 : i32
    return %c0_i32, %c0_i32_0 : i32, i32
  }
  func.func @transform_3(%arg0: i32) -> (i32, i32) {
    %c0_i32 = arith.constant 0 : i32
    %c0_i32_0 = arith.constant 0 : i32
    %c0_i32_1 = arith.constant 0 : i32
    return %c0_i32, %c0_i32_0 : i32, i32
  }
  func.func @transform_4(%arg0: i32) -> (i32, i32) {
    %c0_i32 = arith.constant 0 : i32
    %c0_i32_0 = arith.constant 0 : i32
    %c0_i32_1 = arith.constant 0 : i32
    return %c0_i32, %c0_i32_0 : i32, i32
  }
  func.func @transform_5(%arg0: i32) -> (i32, i32) {
    %c0_i32 = arith.constant 0 : i32
    %c0_i32_0 = arith.constant 0 : i32
    %c0_i32_1 = arith.constant 0 : i32
    return %c0_i32, %c0_i32_0 : i32, i32
  }
  func.func @transform_6(%arg0: i32) -> (i32, i32) {
    %c0_i32 = arith.constant 0 : i32
    %c0_i32_0 = arith.constant 0 : i32
    %c0_i32_1 = arith.constant 0 : i32
    return %c0_i32, %c0_i32_0 : i32, i32
  }
  func.func @transform_7(%arg0: i32) -> (i32, i32) {
    %c0_i32 = arith.constant 0 : i32
    %c0_i32_0 = arith.constant 0 : i32
    %c0_i32_1 = arith.constant 0 : i32
    return %c0_i32, %c0_i32_0 : i32, i32
  }
  func.func @transform_8(%arg0: i32) -> (i32, i32) {
    %c0_i32 = arith.constant 0 : i32
    %c0_i32_0 = arith.constant 0 : i32
    %c0_i32_1 = arith.constant 0 : i32
    return %c0_i32, %c0_i32_0 : i32, i32
  }
  func.func @transform_9(%arg0: i32) -> (i32, i32) {
    %c0_i32 = arith.constant 0 : i32
    %c0_i32_0 = arith.constant 0 : i32
    %c0_i32_1 = arith.constant 0 : i32
    return %c0_i32, %c0_i32_0 : i32, i32
  }
  func.func @transform_10(%arg0: i32) -> (i32, i32) {
    %c0_i32 = arith.constant 0 : i32
    %c0_i32_0 = arith.constant 0 : i32
    %c0_i32_1 = arith.constant 0 : i32
    return %c0_i32, %c0_i32_0 : i32, i32
  }
  func.func @transform_11(%arg0: i32) -> (i32, i32) {
    %c0_i32 = arith.constant 0 : i32
    %c0_i32_0 = arith.constant 0 : i32
    %c0_i32_1 = arith.constant 0 : i32
    return %c0_i32, %c0_i32_0 : i32, i32
  }
  func.func @transform_12(%arg0: i32) -> (i32, i32) {
    %c0_i32 = arith.constant 0 : i32
    %c0_i32_0 = arith.constant 0 : i32
    %c0_i32_1 = arith.constant 0 : i32
    return %c0_i32, %c0_i32_0 : i32, i32
  }
  func.func @transform_13(%arg0: i32) -> (i32, i32) {
    %c0_i32 = arith.constant 0 : i32
    %c0_i32_0 = arith.constant 0 : i32
    return %arg0, %c0_i32 : i32, i32
  }
}

</mosaic_0001>

<bundles_post_ra>
// kernel: tpu_custom_call.1
= control target key start
LH: loop header
LB: loop body
LE: loop exit
PB: predicated region body
PF: predicated region fallthrough
CT: control target
= control target key end

     0   :  { %v595_v1 = vmov 0.0   ;;  %vm71_vm0 = vcmask 1046528   ;;  %vm596_vm1 = vmmov 0   ;;  %vm67_vm2 = vcmask 244736   ;;  %s775_s0 = inlined_call_operand.vmem [shape: f32[4,16], index: 0, kind: input, shape index: {}]   ;;  %s776_s1 = inlined_call_operand.vmem [shape: f32[4,30], index: 1, kind: input, shape index: {}]   ;;  %s777_s2 = inlined_call_operand.vmem [shape: bf16[16,64], index: 2, kind: input, shape index: {}]   ;;  %s778_s3 = inlined_call_operand.vmem [shape: bf16[30,64], index: 3, kind: input, shape index: {}]   ;;  %s779_s4 = inlined_call_operand.vmem [shape: f32[1,64], index: 4, kind: input, shape index: {}]   ;;  %s780_s5 = inlined_call_operand.vmem [shape: f32[1,64], index: 5, kind: input, shape index: {}]   ;;  %s781_s6 = inlined_call_operand.vmem [shape: f32[1,64], index: 6, kind: input, shape index: {}]   ;;  %s782_s7 = inlined_call_operand.vmem [shape: bf16[64,128], index: 7, kind: input, shape index: {}]   ;;  %s783_s8 = inlined_call_operand.vmem [shape: f32[1,128], index: 8, kind: input, shape index: {}]   ;;  %s784_s9 = inlined_call_operand.vmem [shape: f32[1,128], index: 9, kind: input, shape index: {}]   ;;  %s785_s10 = inlined_call_operand.vmem [shape: f32[1,128], index: 10, kind: input, shape index: {}]   ;;  %s786_s11 = inlined_call_operand.vmem [shape: bf16[128,16], index: 11, kind: input, shape index: {}]   ;;  %s787_s12 = inlined_call_operand.vmem [shape: f32[1,16], index: 12, kind: input, shape index: {}]   ;;  %s788_s13 = inlined_call_operand.hbm [shape: f32[4,16], index: 13, kind: output, shape index: {}]  }
   0x1   :  { %v552_v0 = vld [vmem:[%s778_s3] sm:$0xff]   ;;  %503 = vmatprep.subr.bf16.mxu1 %v595_v1  ;;  %v553_v2 = vld [vmem:[%s778_s3 + $0x8] sm:$0x7f]   ;;  %529 = vmatprep.subr.bf16.mxu0 %v595_v1 }
   0x2   :  { %504 = vmatpush3.bf16.msra.mxu1 %v552_v0  ;;  %v48_v3 = vld [vmem:[%s776_s1] sm:$0xf]  ;;  %v73_v4 = vsel %vm71_vm0, %v553_v2, 0  ;;  %507 = vmatprep.mubr.msk.bf16.mxu1 %vm596_vm1, %v595_v1 }
   0x3   :  { %505 = vmatprep.subr.bf16.mxu1 %v595_v1  ;;  %v554_v5 = vld [vmem:[%s777_s2] sm:$0xff]   ;;  %545 = vmatprep.mubr.msk.bf16.mxu0 %vm596_vm1, %v595_v1  ;;  %v49_v6 = vpack.c.bf16 %v48_v3, %v48_v3 }
   0x4   :  { %v46_v7 = vld [vmem:[%s775_s0] sm:$0xf] }
   0x6   :  { %506 = vmatpush3.bf16.msra.mxu1 %v73_v4 }
   0x7   :  { %511 = vmatprep.subr.bf16.mxu1 %v595_v1 }
   0x9   :  { %508 = vmatmul.mubr.msk.bf16.vlgmr.msra.gmra.mrb[0].mxu1 %vm67_vm2, %v49_v6 }
   0xa   :  { %512 = vmatpush3.bf16.msra.mxu1 %v554_v5  ;;  %513 = vmatprep.mubr.msk.bf16.mxu1 %vm596_vm1, %v595_v1 }
   0xb   :  { %517 = vmatprep.subr.bf16.mxu1 %v595_v1 }
   0xc   :  { %18 = vsyncpa [#allocation3], 0  ;;  %v47_v8 = vpack.c.bf16 %v46_v7, %v46_v7  ;;  %vm121_vm3 = vcmask 130048   ;;  %v464_v14 = vld [vmem:[%s779_s4] ss:$0 sm:$0xff]  ;;  %vm175_vm4 = vcmask 519168  }
   0xd   :  { %v555_v23 = vld [vmem:[%s782_s7] sm:$0xff]   ;;  %v556_v24 = vld [vmem:[%s782_s7 + $0x8] sm:$0xff]   ;;  %v557_v25 = vld [vmem:[%s782_s7 + $0x10] sm:$0xff]   ;;  %vm250_vm6 = vcmask 523264   ;;  %vm296_vm7 = vcmask 1043456   ;;  %s597_s24 = smov [#allocation2]  }
   0xe   :  { %v558_v26 = vld [vmem:[%s782_s7 + $0x18] sm:$0xff]   ;;  %v465_v37 = vld [vmem:[%s780_s5] ss:$0 sm:$0xff]  ;;  %v560_v55 = vld [vmem:[%s786_s11 + $0x8] sm:$0xff]   ;;  %s451_s7 = sshll.u32 %s597_s24, 4  ;;  %vm443_vm9 = vcmask 125952   ;;  %s452_s7 = int_to_ptr.vmem [resolvable:$true] %s451_s7 }
   0xf   :  { %v466_v39 = vld [vmem:[%s781_s6] ss:$0 sm:$0xff]  ;;  %v561_v56 = vld [vmem:[%s786_s11 + $0x10] sm:$0xff]   ;;  %v562_v57 = vld [vmem:[%s786_s11 + $0x18] sm:$0xff]   ;;  %p576_p1 = scmp.lt.s32.totalorder %s452_s7, %s452_s7 }
  0x10   :  { %v467_v45 = vld [vmem:[%s783_s8] ss:$0 sm:$0xff]  ;;  %v564_v59 = vld [vmem:[%s786_s11 + $0x28] sm:$0xff]   ;;  %v565_v60 = vld [vmem:[%s786_s11 + $0x30] sm:$0xff]  }
  0x11   :  { %514 = vmatmul.mubr.msk.bf16.vlgmr.msra.gmra.mrb[4].mxu1 %vm121_vm3, %v47_v8  ;;  %v559_v54 = vld [vmem:[%s786_s11] sm:$0xff]   ;;  %v566_v61 = vld [vmem:[%s786_s11 + $0x38] sm:$0xff]  }
  0x12   :  { %525 = vmatprep.mubr.msk.bf16.mxu1 %vm596_vm1, %v595_v1  ;;  %518 = vmatpush3.bf16.msra.mxu1 %v555_v23  ;;  %v563_v58 = vld [vmem:[%s786_s11 + $0x20] sm:$0xff]  }
  0x13   :  { %519 = vmatprep.subr.bf16.mxu1 %v595_v1  ;;  %530 = vmatpush3.bf16.msra.mxu0 %v559_v54 }
  0x14   :  { %531 = vmatprep.subr.bf16.mxu0 %v595_v1 }
  0x16   :  { %520 = vmatpush3.bf16.msra.mxu1 %v556_v24 }
  0x17   :  { %521 = vmatprep.subr.bf16.mxu1 %v595_v1  ;;  %532 = vmatpush3.bf16.msra.mxu0 %v560_v55 }
  0x18   :  { %533 = vmatprep.subr.bf16.mxu0 %v595_v1 }
  0x1a   :  { %522 = vmatpush3.bf16.msra.mxu1 %v557_v25 }
  0x1b   :  { %523 = vmatprep.subr.bf16.mxu1 %v595_v1  ;;  %534 = vmatpush3.bf16.msra.mxu0 %v561_v56 }
  0x1c   :  { %535 = vmatprep.subr.bf16.mxu0 %v595_v1 }
  0x1e   :  { %524 = vmatpush3.bf16.msra.mxu1 %v558_v26 }
  0x1f   :  { %536 = vmatpush3.bf16.msra.mxu0 %v562_v57 }
  0x20   :  { %537 = vmatprep.subr.bf16.mxu0 %v595_v1 }
  0x23   :  { %538 = vmatpush3.bf16.msra.mxu0 %v563_v58 }
  0x24   :  { %539 = vmatprep.subr.bf16.mxu0 %v595_v1 }
  0x27   :  { %540 = vmatpush3.bf16.msra.mxu0 %v564_v59 }
  0x28   :  { %541 = vmatprep.subr.bf16.mxu0 %v595_v1 }
  0x2b   :  { %542 = vmatpush3.bf16.msra.mxu0 %v565_v60 }
  0x2c   :  { %543 = vmatprep.subr.bf16.mxu0 %v595_v1  ;;  %v474_v1 = vld [vmem:[%s785_s10] ss:$0 sm:$0xff] }
  0x2f   :  { %544 = vmatpush3.bf16.msra.mxu0 %v566_v61 }
  0xdc   :  { %v109_v9 = vpop.f32.mrb[0].mxu1 }
  0xdd   :  { %v509_v10 = vpop.f32.mrb[1].mxu1 }
  0xde   :  { %v112_v11 = vpop.f32.mrb[2].mxu1 }
  0xdf   :  { %v510_v12 = vpop.f32.mrb[3].mxu1 }
  0xe4   :  { %v159_v13 = vpop.f32.mrb[4].mxu1 }
  0xe5   :  { %v160_v15 = vadd.f32 %v159_v13, %v109_v9  ;;  %v515_v16 = vpop.f32.mrb[5].mxu1  ;;  %v473_v9 = vld [vmem:[%s784_s9] ss:$0 sm:$0xff]  ;;  %s571_s9 = scalar_lea.vmem %s452_s7, 64 }
  0xe6   :  { %v162_v17 = vpop.f32.mrb[6].mxu1  ;;  %v475_v16 = vld [vmem:[%s787_s12] ss:$0 sm:$0xff]  ;;  %p572_p0 = scmp.ne.s32.totalorder %s452_s7, %s571_s9  ;;  %p577_p2 = scmp.lt.s32.totalorder %s571_s9, %s571_s9 }
  0xe7   :  { %v172_v18 = vadd.f32 %v464_v14, %v160_v15  ;;  %v516_v19 = vpop.f32.mrb[7].mxu1 }
  0xe8   :  { %p578_p3 = por %p577_p2, %p576_p1 }
  0xe9   :  { %v176_v20 = vsel %vm175_vm4, %v172_v18, 0.0  ;;  %v181_v21 = vmul.f32 %v172_v18, %v172_v18 }
  0xea   :  { %177 = vadd.xlane.f32.xlu0 %v176_v20  ;;  %p579_p4 = pnand %p578_p3, %p572_p0 }
  0xeb   :  { %v182_v22 = vsel %vm175_vm4, %v181_v21, 0.0 }
  0xee   :  { %183 = vadd.xlane.f32.xlu0 %v182_v22 }
 0x177   :  { %v178_v27 = vpop.xlane.xlu0 %177 }
 0x178   :  { %v180_v28 = vmul.f32 0.015625, %v178_v27 }
 0x17a   :  { %v186_v30 = vmul.f32 %v180_v28, %v180_v28  ;;  %v189_v35 = vsub.f32 %v172_v18, %v180_v28 }
 0x17b   :  { %v184_v29 = vpop.xlane.xlu0 %183 }
 0x17c   :  { %v185_v31 = vmul.f32 0.015625, %v184_v29 }
 0x17e   :  { %v187_v32 = vsub.f32 %v185_v31, %v186_v30 }
 0x180   :  { %v188_v33 = vmax.f32 %v187_v32, 0.0 }
 0x182   :  { %v190_v34 = vadd.f32 1e-05, %v188_v33 }
 0x184   :  { %567 = vrsqrt.f32 %v190_v34 }
 0x18e   :  { %v568_v36 = vpop.eup %567 }
 0x18f   :  { %v192_v38 = vmul.f32 %v568_v36, %v189_v35 }
 0x191   :  { %v199_v40 = vmul.f32 %v465_v37, %v192_v38 }
 0x193   :  { %v206_v41 = vadd.f32 %v466_v39, %v199_v40 }
 0x195   :  { %vm207_vm5 = vcmp.ge.f32.partialorder %v206_v41, 0.0  ;;  %v208_v42 = vmul.f32 0.2, %v206_v41 }
 0x197   :  { %v209_v43 = vsel %vm207_vm5, %v206_v41, %v208_v42 }
 0x198   :  { %v210_v44 = vpack.c.bf16 %v209_v43, %v209_v43 }
 0x19a   :  { %526 = vmatmul.mubr.msk.bf16.vlgmr.msra.gmra.mrb[8].mxu1 %vm250_vm6, %v210_v44 }
 0x26d   :  { %v288_v46 = vpop.f32.mrb[8].mxu1 }
 0x26e   :  { %v289_v47 = vadd.f32 %v467_v45, %v288_v46  ;;  %v527_v48 = vpop.f32.mrb[9].mxu1 }
 0x26f   :  { %v291_v49 = vpop.f32.mrb[10].mxu1 }
 0x270   :  { %v528_v50 = vpop.f32.mrb[11].mxu1  ;;  %v297_v51 = vsel %vm296_vm7, %v289_v47, 0.0  ;;  %v302_v52 = vmul.f32 %v289_v47, %v289_v47 }
 0x271   :  { %298 = vadd.xlane.f32.xlu1 %v297_v51 }
 0x272   :  { %v303_v53 = vsel %vm296_vm7, %v302_v52, 0.0 }
 0x275   :  { %304 = vadd.xlane.f32.xlu1 %v303_v53 }
 0x2fe   :  { %v299_v62 = vpop.xlane.xlu1 %298 }
 0x2ff   :  { %v301_v63 = vmul.f32 0.0078125, %v299_v62 }
 0x301   :  { %v307_v2 = vmul.f32 %v301_v63, %v301_v63  ;;  %v310_v7 = vsub.f32 %v289_v47, %v301_v63 }
 0x302   :  { %v305_v0 = vpop.xlane.xlu1 %304 }
 0x303   :  { %v306_v3 = vmul.f32 0.0078125, %v305_v0 }
 0x305   :  { %v308_v4 = vsub.f32 %v306_v3, %v307_v2 }
 0x307   :  { %v309_v5 = vmax.f32 %v308_v4, 0.0 }
 0x309   :  { %v311_v6 = vadd.f32 1e-05, %v309_v5 }
 0x30b   :  { %569 = vrsqrt.f32 %v311_v6 }
 0x315   :  { %v570_v8 = vpop.eup %569 }
 0x316   :  { %v313_v10 = vmul.f32 %v570_v8, %v310_v7 }
 0x318   :  { %v320_v11 = vmul.f32 %v473_v9, %v313_v10 }
 0x31a   :  { %v327_v12 = vadd.f32 %v474_v1, %v320_v11 }
 0x31c   :  { %vm328_vm8 = vcmp.ge.f32.partialorder %v327_v12, 0.0  ;;  %v329_v13 = vmul.f32 0.2, %v327_v12 }
 0x31e   :  { %v330_v14 = vsel %vm328_vm8, %v327_v12, %v329_v13 }
 0x31f   :  { %v331_v15 = vpack.c.bf16 %v330_v14, %v330_v14 }
 0x321   :  { %546 = vmatmul.mubr.bf16.vlgmr.msra.gmra.mrb[0].mxu0 %v331_v15 }
 0x3f4   :  { %v437_v17 = vpop.f32.mrb[0].mxu0 }
 0x3f5   :  { %v438_v18 = vadd.f32 %v475_v16, %v437_v17  ;;  %v547_v19 = vpop.f32.mrb[1].mxu0 }
 0x3f6   :  { %v440_v20 = vpop.f32.mrb[2].mxu0 }
 0x3f7   :  { %v548_v21 = vpop.f32.mrb[3].mxu0  ;;  %444 = vst.msk [vmem:[#allocation2] sm:$0xf] %vm443_vm9, %v438_v18 }
 0x3f8   :  { %582 = shalt.err (!%p579_p4)
}
 0x3f9   :  { %s583_s12 = scalar_lea.hbm %s788_s13, 64 }
 0x3fa   :  { %p584_p5 = scmp.ne.s32.totalorder %s788_s13, %s583_s12  ;;  %p587_p6 = scmp.lt.u32.totalorder %s583_s12, %s788_s13 }
 0x3fc   :  { %p589_p7 = pnand %p587_p6, %p584_p5 }
 0x3fe   :  { %592 = shalt.err (!%p589_p7)
}
 0x3ff   :  { %454 = dma.vmem_to_hbm [thread:$0]  %s452_s7, 64, %s788_s13, [#allocation3]  }
 0x400   :  { %593 = dma.done.wait [#allocation3], 64  }
 0x401   :  { %594 = vsyncadd [#allocation3], 4294967232 }
 0x402   :  { %458 = vsyncpa [#allocation3], 1 }

</bundles_post_ra>
